<compile_context>
chip_gen: v5e
topology: v5e:2x2
jax: 0.10.0
libtpu: 0.0.40
codegen_flags: <defaults>
</compile_context>

<pallas_src>
import jax
import jax.numpy as jnp
from jax.experimental import pallas as pl
from jax.experimental.pallas import tpu as pltpu


def _round_up(n, m):
    return ((n + m - 1) // m) * m


def combined_actor_kernel(x_ref, w1_ref, b1_ref, w2_ref, b2_ref,
                          w3_ref, b3_ref, w4_ref, b4_ref, out_ref):
    """Whole MLP + softmax for one batch tile; bf16 MXU operands, f32 accumulation."""
    # fc1 + ReLU   (state_dim -> 512); x cast to bf16 in-kernel, K unpadded
    h = jnp.dot(x_ref[...].astype(jnp.bfloat16), w1_ref[...],
                preferred_element_type=jnp.float32) + b1_ref[...]
    h = jnp.maximum(h, 0.0)
    # TODO(synk): nn.Dropout(0.1) is identity in eval mode; training-mode dropout
    # would use pltpu.prng_random_bits — intentionally omitted here.

    # fc2 + ReLU   (512 -> 256)
    h = jnp.dot(h.astype(jnp.bfloat16), w2_ref[...],
                preferred_element_type=jnp.float32) + b2_ref[...]
    h = jnp.maximum(h, 0.0)

    # fc3 + ReLU   (256 -> 128)
    h = jnp.dot(h.astype(jnp.bfloat16), w3_ref[...],
                preferred_element_type=jnp.float32) + b3_ref[...]
    h = jnp.maximum(h, 0.0)

    # fc_action    (128 -> n_out_padded); pad lanes carry a -1e30 bias (f32) so the
    # softmax below gives them exactly 0 probability (exp underflows to 0).
    logits = jnp.dot(h.astype(jnp.bfloat16), w4_ref[...],
                     preferred_element_type=jnp.float32) + b4_ref[...]

    # numerically-stable softmax over the lane-dense (128-wide) last axis.
    # Exact division: this kernel is MXU/HBM-bound, the approximate reciprocal
    # gains nothing and breaks row-sum==1 for downstream categorical sampling.
    m = jnp.max(logits, axis=-1, keepdims=True)
    e = jnp.exp(logits - m)
    denom = jnp.sum(e, axis=-1, keepdims=True)
    out_ref[...] = (e / denom).astype(out_ref.dtype)


def prepare_params(params):
    """One-time weight preparation (padding + bf16 casting).

    Call this ONCE after loading/updating the network and reuse the result for
    every forward call — none of this work runs in the per-inference path.
    Weights come in as (in_features, out_features); biases as (1, out_features).
    """
    w1, b1, w2, b2, w3, b3, w4, b4 = params
    action_dim = w4.shape[1]
    n_out = _round_up(max(action_dim, 128), 128)   # lane-dense output width

    w1p = w1.astype(jnp.bfloat16)                  # K left unpadded (MXU pads internally)
    w2p = w2.astype(jnp.bfloat16)
    w3p = w3.astype(jnp.bfloat16)
    w4p = jnp.zeros((128, n_out), jnp.bfloat16).at[:, :action_dim].set(
        w4.astype(jnp.bfloat16))

    # Biases stay f32 (added after f32 accumulation). b4 pad lanes get -1e30 —
    # MUST stay f32 (a bf16 cast would turn it into -inf and risk NaNs).
    b1p = b1.reshape(1, -1).astype(jnp.float32)
    b2p = b2.reshape(1, -1).astype(jnp.float32)
    b3p = b3.reshape(1, -1).astype(jnp.float32)
    b4p = jnp.full((1, n_out), -1e30, jnp.float32).at[:, :action_dim].set(
        b4.reshape(1, -1).astype(jnp.float32))

    prepared = (w1p, b1p, w2p, b2p, w3p, b3p, w4p, b4p)
    return jax.block_until_ready(prepared), action_dim


def combined_actor_forward(x, prepared_params, action_dim, *,
                           tile_m=1024, out_dtype=jnp.float32):
    """x: (batch, state_dim) float32. prepared_params: output of prepare_params().
    Returns (batch, action_dim) softmax probabilities.

    out_dtype=jnp.bfloat16 halves output writeback (worth ~25-30%/tile at large
    batch on v6e, which sits at the HBM roofline); default f32 keeps exact
    row sums for the PPO sampler.
    """
    w1p, b1p, w2p, b2p, w3p, b3p, w4p, b4p = prepared_params
    batch, state_dim = x.shape
    n_out = w4p.shape[1]

    # ---- batch tiling ----
    if batch <= 256:
        # Single grid step; block == full array dims, so no row/col padding of x
        # is materialized at all.
        tile, m_pad = batch, batch
    else:
        # >= 2 grid steps so v7x's two TensorCores both get work (dimension
        # semantics "parallel" shards the batch axis), capped at tile_m rows to
        # amortize the ~0.35 us per-grid-step overhead.
        tile = min(tile_m, _round_up((batch + 1) // 2, 8))
        m_pad = _round_up(batch, tile)

    xp = x if m_pad == batch else jnp.pad(x, ((0, m_pad - batch), (0, 0)))
    grid = (m_pad // tile,)

    def const(shape):  # grid-invariant block: full array, same block every step
        return pl.BlockSpec(shape, lambda i: (0, 0))

    # NOTE(v6e): if profiles show exposed DMA, add pipeline_mode=pl.Buffered(3)
    # to the x/out BlockSpecs; not needed on v5e (MXU-bound) or v7x (HBM headroom).
    probs_padded = pl.pallas_call(
        combined_actor_kernel,
        out_shape=jax.ShapeDtypeStruct((m_pad, n_out), out_dtype),
        grid=grid,
        in_specs=[
            pl.BlockSpec((tile, state_dim), lambda i: (i, 0)),   # x tile, K unpadded
            const(w1p.shape), const(b1p.shape),
            const(w2p.shape), const(b2p.shape),
            const(w3p.shape), const(b3p.shape),
            const(w4p.shape), const(b4p.shape),
        ],
        out_specs=pl.BlockSpec((tile, n_out), lambda i: (i, 0)),
        compiler_params=pltpu.CompilerParams(
            dimension_semantics=("parallel",),
            vmem_limit_bytes=64 * 1024 * 1024,
        ),
    )(xp, w1p, b1p, w2p, b2p, w3p, b3p, w4p, b4p)

    return probs_padded[:batch, :action_dim]


def init_params(key, state_dim, action_dim):
    """Deterministic init mimicking PyTorch nn.Linear (U(-1/sqrt(fan_in), +1/sqrt(fan_in))).
    Weights are stored as (in_features, out_features); biases as (1, out_features)."""
    dims = [(state_dim, 512), (512, 256), (256, 128), (128, action_dim)]
    params = []
    for (fan_in, fan_out) in dims:
        key, kw, kb = jax.random.split(key, 3)
        bound = 1.0 / jnp.sqrt(jnp.float32(fan_in))
        w = jax.random.uniform(kw, (fan_in, fan_out), jnp.float32, -bound, bound)
        b = jax.random.uniform(kb, (1, fan_out), jnp.float32, -bound, bound)
        params += [w, b]
    return tuple(params)


def reference_forward(x, params):
    """Pure-JAX f32 reference matching the PyTorch module in eval mode."""
    w1, b1, w2, b2, w3, b3, w4, b4 = params
    h = jnp.maximum(x @ w1 + b1, 0.0)
    h = jnp.maximum(h @ w2 + b2, 0.0)
    h = jnp.maximum(h @ w3 + b3, 0.0)
    logits = h @ w4 + b4
    return jax.nn.softmax(logits, axis=-1)


if __name__ == "__main__":
    key = jax.random.PRNGKey(0)
    batch, state_dim, action_dim = 8, 32, 16

    key, kx = jax.random.split(key)
    x = jax.random.normal(kx, (batch, state_dim), jnp.float32)
    params = init_params(key, state_dim, action_dim)

    # One-time weight preparation (hoisted out of the per-call path).
    prepared, action_dim_out = prepare_params(params)

    probs = combined_actor_forward(x, prepared, action_dim_out)
    probs = jax.block_until_ready(probs)

    ref = reference_forward(x, params)
    assert probs.shape == (batch, action_dim)
    # Exact softmax division -> rows sum to 1 up to f32 rounding.
    assert jnp.allclose(jnp.sum(probs, axis=-1), 1.0, atol=1e-3)
    # bf16 matmul operands -> looser tolerance vs. the pure-f32 reference.
    assert jnp.allclose(probs, ref, atol=2e-2, rtol=2e-2)

    print("KERNEL_OK")
</pallas_src>

<mosaic_0001>
module attributes {stable_mosaic.version = 11 : i64} {
  func.func @combined_actor_kernel(%arg0: i32, %arg1: memref<8x32xf32, #tpu.memory_space<vmem>>, %arg2: memref<32x512xbf16, #tpu.memory_space<vmem>>, %arg3: memref<1x512xf32, #tpu.memory_space<vmem>>, %arg4: memref<512x256xbf16, #tpu.memory_space<vmem>>, %arg5: memref<1x256xf32, #tpu.memory_space<vmem>>, %arg6: memref<256x128xbf16, #tpu.memory_space<vmem>>, %arg7: memref<1x128xf32, #tpu.memory_space<vmem>>, %arg8: memref<128x128xbf16, #tpu.memory_space<vmem>>, %arg9: memref<1x128xf32, #tpu.memory_space<vmem>>, %arg10: memref<8x128xf32, #tpu.memory_space<vmem>>) attributes {dimension_semantics = [#tpu.dimension_semantics<parallel>], iteration_bounds = array<i64: 1>, scalar_prefetch = 0 : i64, scratch_operands = 0 : i64, tpu.core_type = #tpu.core_type<tc>, window_params = [{transform_indices = @transform_0, window_bounds = array<i64: 8, 32>}, {pipeline_mode = #tpu.pipeline_mode<synchronous>, transform_indices = @transform_1, window_bounds = array<i64: 32, 512>}, {pipeline_mode = #tpu.pipeline_mode<synchronous>, transform_indices = @transform_2, window_bounds = array<i64: 1, 512>}, {pipeline_mode = #tpu.pipeline_mode<synchronous>, transform_indices = @transform_3, window_bounds = array<i64: 512, 256>}, {pipeline_mode = #tpu.pipeline_mode<synchronous>, transform_indices = @transform_4, window_bounds = array<i64: 1, 256>}, {pipeline_mode = #tpu.pipeline_mode<synchronous>, transform_indices = @transform_5, window_bounds = array<i64: 256, 128>}, {pipeline_mode = #tpu.pipeline_mode<synchronous>, transform_indices = @transform_6, window_bounds = array<i64: 1, 128>}, {pipeline_mode = #tpu.pipeline_mode<synchronous>, transform_indices = @transform_7, window_bounds = array<i64: 128, 128>}, {pipeline_mode = #tpu.pipeline_mode<synchronous>, transform_indices = @transform_8, window_bounds = array<i64: 1, 128>}, {transform_indices = @transform_9, window_bounds = array<i64: 8, 128>}]} {
    %c0 = arith.constant 0 : index
    %c0_0 = arith.constant 0 : index
    %0 = vector.load %arg1[%c0, %c0_0] : memref<8x32xf32, #tpu.memory_space<vmem>>, vector<8x32xf32>
    %1 = arith.truncf %0 : vector<8x32xf32> to vector<8x32xbf16>
    %c0_1 = arith.constant 0 : index
    %c0_2 = arith.constant 0 : index
    %2 = vector.load %arg2[%c0_1, %c0_2] : memref<32x512xbf16, #tpu.memory_space<vmem>>, vector<32x512xbf16>
    %cst = arith.constant dense<0.000000e+00> : vector<8x512xf32>
    %3 = tpu.matmul %1, %2, %cst {dimension_numbers = #tpu.dot_dimension_numbers<[1], [0], [0], [1], [0, 0, 1, 1], [], []>} : vector<8x32xbf16>, vector<32x512xbf16>, vector<8x512xf32> -> vector<8x512xf32>
    %c0_3 = arith.constant 0 : index
    %c0_4 = arith.constant 0 : index
    %4 = vector.load %arg3[%c0_3, %c0_4] : memref<1x512xf32, #tpu.memory_space<vmem>>, vector<1x512xf32>
    %5 = vector.broadcast %4 : vector<1x512xf32> to vector<8x512xf32>
    %6 = arith.addf %3, %5 : vector<8x512xf32>
    %cst_5 = arith.constant 0.000000e+00 : f32
    %7 = vector.broadcast %cst_5 : f32 to vector<8x512xf32>
    %8 = arith.maximumf %6, %7 : vector<8x512xf32>
    %9 = arith.truncf %8 : vector<8x512xf32> to vector<8x512xbf16>
    %c0_6 = arith.constant 0 : index
    %c0_7 = arith.constant 0 : index
    %10 = vector.load %arg4[%c0_6, %c0_7] : memref<512x256xbf16, #tpu.memory_space<vmem>>, vector<512x256xbf16>
    %cst_8 = arith.constant dense<0.000000e+00> : vector<8x256xf32>
    %11 = tpu.matmul %9, %10, %cst_8 {dimension_numbers = #tpu.dot_dimension_numbers<[1], [0], [0], [1], [0, 0, 1, 1], [], []>} : vector<8x512xbf16>, vector<512x256xbf16>, vector<8x256xf32> -> vector<8x256xf32>
    %c0_9 = arith.constant 0 : index
    %c0_10 = arith.constant 0 : index
    %12 = vector.load %arg5[%c0_9, %c0_10] : memref<1x256xf32, #tpu.memory_space<vmem>>, vector<1x256xf32>
    %13 = vector.broadcast %12 : vector<1x256xf32> to vector<8x256xf32>
    %14 = arith.addf %11, %13 : vector<8x256xf32>
    %cst_11 = arith.constant 0.000000e+00 : f32
    %15 = vector.broadcast %cst_11 : f32 to vector<8x256xf32>
    %16 = arith.maximumf %14, %15 : vector<8x256xf32>
    %17 = arith.truncf %16 : vector<8x256xf32> to vector<8x256xbf16>
    %c0_12 = arith.constant 0 : index
    %c0_13 = arith.constant 0 : index
    %18 = vector.load %arg6[%c0_12, %c0_13] : memref<256x128xbf16, #tpu.memory_space<vmem>>, vector<256x128xbf16>
    %cst_14 = arith.constant dense<0.000000e+00> : vector<8x128xf32>
    %19 = tpu.matmul %17, %18, %cst_14 {dimension_numbers = #tpu.dot_dimension_numbers<[1], [0], [0], [1], [0, 0, 1, 1], [], []>} : vector<8x256xbf16>, vector<256x128xbf16>, vector<8x128xf32> -> vector<8x128xf32>
    %c0_15 = arith.constant 0 : index
    %c0_16 = arith.constant 0 : index
    %20 = vector.load %arg7[%c0_15, %c0_16] : memref<1x128xf32, #tpu.memory_space<vmem>>, vector<1x128xf32>
    %21 = vector.broadcast %20 : vector<1x128xf32> to vector<8x128xf32>
    %22 = arith.addf %19, %21 : vector<8x128xf32>
    %cst_17 = arith.constant 0.000000e+00 : f32
    %23 = vector.broadcast %cst_17 : f32 to vector<8x128xf32>
    %24 = arith.maximumf %22, %23 : vector<8x128xf32>
    %25 = arith.truncf %24 : vector<8x128xf32> to vector<8x128xbf16>
    %c0_18 = arith.constant 0 : index
    %c0_19 = arith.constant 0 : index
    %26 = vector.load %arg8[%c0_18, %c0_19] : memref<128x128xbf16, #tpu.memory_space<vmem>>, vector<128x128xbf16>
    %cst_20 = arith.constant dense<0.000000e+00> : vector<8x128xf32>
    %27 = tpu.matmul %25, %26, %cst_20 {dimension_numbers = #tpu.dot_dimension_numbers<[1], [0], [0], [1], [0, 0, 1, 1], [], []>} : vector<8x128xbf16>, vector<128x128xbf16>, vector<8x128xf32> -> vector<8x128xf32>
    %c0_21 = arith.constant 0 : index
    %c0_22 = arith.constant 0 : index
    %28 = vector.load %arg9[%c0_21, %c0_22] : memref<1x128xf32, #tpu.memory_space<vmem>>, vector<1x128xf32>
    %29 = vector.broadcast %28 : vector<1x128xf32> to vector<8x128xf32>
    %30 = arith.addf %27, %29 : vector<8x128xf32>
    %cst_23 = arith.constant dense<0xFF800000> : vector<8xf32>
    %31 = vector.multi_reduction <maximumf>, %30, %cst_23 [1] : vector<8x128xf32> to vector<8xf32>
    %32 = vector.shape_cast %31 : vector<8xf32> to vector<8x1xf32>
    %33 = vector.broadcast %32 : vector<8x1xf32> to vector<8x128xf32>
    %34 = arith.subf %30, %33 : vector<8x128xf32>
    %35 = math.exp %34 : vector<8x128xf32>
    %cst_24 = arith.constant dense<0.000000e+00> : vector<8xf32>
    %36 = vector.multi_reduction <add>, %35, %cst_24 [1] : vector<8x128xf32> to vector<8xf32>
    %37 = vector.shape_cast %36 : vector<8xf32> to vector<8x1xf32>
    %38 = vector.broadcast %37 : vector<8x1xf32> to vector<8x128xf32>
    %39 = arith.divf %35, %38 : vector<8x128xf32>
    %c0_25 = arith.constant 0 : index
    %c0_26 = arith.constant 0 : index
    %40 = vector.load %arg10[%c0_25, %c0_26] : memref<8x128xf32, #tpu.memory_space<vmem>>, vector<8x128xf32>
    tpu.vector_store %arg10[%c0_25, %c0_26], %39 {strides = array<i32>} : memref<8x128xf32, #tpu.memory_space<vmem>>, vector<8x128xf32>,
    return
  }
  func.func @transform_0(%arg0: i32) -> (i32, i32) {
    %c0_i32 = arith.constant 0 : i32
    %c0_i32_0 = arith.constant 0 : i32
    return %arg0, %c0_i32 : i32, i32
  }
  func.func @transform_1(%arg0: i32) -> (i32, i32) {
    %c0_i32 = arith.constant 0 : i32
    %c0_i32_0 = arith.constant 0 : i32
    %c0_i32_1 = arith.constant 0 : i32
    return %c0_i32, %c0_i32_0 : i32, i32
  }
  func.func @transform_2(%arg0: i32) -> (i32, i32) {
    %c0_i32 = arith.constant 0 : i32
    %c0_i32_0 = arith.constant 0 : i32
    %c0_i32_1 = arith.constant 0 : i32
    return %c0_i32, %c0_i32_0 : i32, i32
  }
  func.func @transform_3(%arg0: i32) -> (i32, i32) {
    %c0_i32 = arith.constant 0 : i32
    %c0_i32_0 = arith.constant 0 : i32
    %c0_i32_1 = arith.constant 0 : i32
    return %c0_i32, %c0_i32_0 : i32, i32
  }
  func.func @transform_4(%arg0: i32) -> (i32, i32) {
    %c0_i32 = arith.constant 0 : i32
    %c0_i32_0 = arith.constant 0 : i32
    %c0_i32_1 = arith.constant 0 : i32
    return %c0_i32, %c0_i32_0 : i32, i32
  }
  func.func @transform_5(%arg0: i32) -> (i32, i32) {
    %c0_i32 = arith.constant 0 : i32
    %c0_i32_0 = arith.constant 0 : i32
    %c0_i32_1 = arith.constant 0 : i32
    return %c0_i32, %c0_i32_0 : i32, i32
  }
  func.func @transform_6(%arg0: i32) -> (i32, i32) {
    %c0_i32 = arith.constant 0 : i32
    %c0_i32_0 = arith.constant 0 : i32
    %c0_i32_1 = arith.constant 0 : i32
    return %c0_i32, %c0_i32_0 : i32, i32
  }
  func.func @transform_7(%arg0: i32) -> (i32, i32) {
    %c0_i32 = arith.constant 0 : i32
    %c0_i32_0 = arith.constant 0 : i32
    %c0_i32_1 = arith.constant 0 : i32
    return %c0_i32, %c0_i32_0 : i32, i32
  }
  func.func @transform_8(%arg0: i32) -> (i32, i32) {
    %c0_i32 = arith.constant 0 : i32
    %c0_i32_0 = arith.constant 0 : i32
    %c0_i32_1 = arith.constant 0 : i32
    return %c0_i32, %c0_i32_0 : i32, i32
  }
  func.func @transform_9(%arg0: i32) -> (i32, i32) {
    %c0_i32 = arith.constant 0 : i32
    %c0_i32_0 = arith.constant 0 : i32
    return %arg0, %c0_i32 : i32, i32
  }
}

</mosaic_0001>

<bundles_post_ra>
// kernel: tpu_custom_call.1
= control target key start
LH: loop header
LB: loop body
LE: loop exit
PB: predicated region body
PF: predicated region fallthrough
CT: control target
= control target key end

     0   :  { %14 = vsyncpa [#allocation3], 0  ;;  %s1814_s0 = inlined_call_operand.hbm [shape: f32[8,32], index: 0, kind: input, shape index: {}]   ;;  %s1815_s1 = inlined_call_operand.hbm [shape: bf16[32,512], index: 1, kind: input, shape index: {}]   ;;  %s1816_s2 = inlined_call_operand.hbm [shape: f32[1,512], index: 2, kind: input, shape index: {}]   ;;  %s1817_s3 = inlined_call_operand.hbm [shape: bf16[512,256], index: 3, kind: input, shape index: {}]   ;;  %s1818_s4 = inlined_call_operand.vmem [shape: f32[1,256], index: 4, kind: input, shape index: {}]   ;;  %s1819_s5 = inlined_call_operand.hbm [shape: bf16[256,128], index: 5, kind: input, shape index: {}]   ;;  %s1820_s6 = inlined_call_operand.vmem [shape: f32[1,128], index: 6, kind: input, shape index: {}]   ;;  %s1821_s7 = inlined_call_operand.hbm [shape: bf16[128,128], index: 7, kind: input, shape index: {}]   ;;  %s1822_s8 = inlined_call_operand.vmem [shape: f32[1,128], index: 8, kind: input, shape index: {}]   ;;  %s1823_s9 = inlined_call_operand.hbm [shape: f32[8,128], index: 9, kind: output, shape index: {}]  }
   0x1   :  { %15 = vsyncpa [#allocation6], 0 }
   0x2   :  { %16 = vsyncpa [#allocation9], 0 }
   0x3   :  { %17 = vsyncpa [#allocation12], 0  ;;  %s34_s11 = sshll.u32 %s1815_s1, 4  ;;  %s35_s11 = int_to_ptr.hbm [resolvable:$true] %s34_s11 }
   0x4   :  { %18 = vsyncpa [#allocation4], 0  ;;  %s1711_s12 = smov [#allocation5]   ;;  %s58_s16 = sshll.u32 %s1817_s3, 4  ;;  %s59_s16 = int_to_ptr.hbm [resolvable:$true] %s58_s16 }
   0x5   :  { %s36_s13 = sshll.u32 %s1711_s12, 4  ;;  %s1712_s17 = smov 256   ;;  %s37_s13 = int_to_ptr.vmem [resolvable:$true] %s36_s13 }
   0x6   :  { %s1713_s18 = smov 16   ;;  %s1714_s19 = smov [#allocation8]  }
   0x7   :  { %42 = dma.hbm_to_vmem [thread:$0]  %s35_s11, 1024, %s37_s13, [#allocation6], %s1712_s17, %s1712_s17, %s1713_s18  }
   0x8   :  { %s60_s20 = sshll.u32 %s1714_s19, 4  ;;  %s1715_s21 = smov 128   ;;  %s61_s20 = int_to_ptr.vmem [resolvable:$true] %s60_s20 }
   0x9   :  { %s1716_s22 = smov 8   ;;  %s24_s24 = sshll.u32 %s1814_s0, 4  ;;  %s25_s24 = int_to_ptr.hbm [resolvable:$true] %s24_s24 }
   0xa   :  { %66 = dma.hbm_to_vmem [thread:$0]  %s59_s16, 8192, %s61_s20, [#allocation9], %s1715_s21, %s1715_s21, %s1716_s22  }
   0xb   :  { %s1717_s25 = smov [#allocation2]   ;;  %s48_s28 = sshll.u32 %s1816_s2, 4  ;;  %s49_s28 = int_to_ptr.hbm [resolvable:$true] %s48_s28 }
   0xc   :  { %s26_s26 = sshll.u32 %s1717_s25, 4  ;;  %s1718_s29 = smov [#allocation7]   ;;  %s27_s26 = int_to_ptr.vmem [resolvable:$true] %s26_s26 }
   0xd   :  { %29 = dma.hbm_to_vmem [thread:$0]  %s25_s24, 128, %s27_s26, [#allocation3]  }
   0xe   :  { %s50_s30 = sshll.u32 %s1718_s29, 4  ;;  %s73_s12 = sshll.u32 %s1819_s5, 4  ;;  %s51_s30 = int_to_ptr.vmem [resolvable:$true] %s50_s30  ;;  %s74_s12 = int_to_ptr.hbm [resolvable:$true] %s73_s12 }
   0xf   :  { %53 = dma.hbm_to_vmem [thread:$0]  %s49_s28, 64, %s51_s30, [#allocation6]  }
  0x10   :  { %s1719_s0 = smov [#allocation10]   ;;  %s88_s16 = sshll.u32 %s1821_s7, 4  ;;  %s89_s16 = int_to_ptr.hbm [resolvable:$true] %s88_s16 }
  0x11   :  { %s75_s13 = sshll.u32 %s1719_s0, 4  ;;  %s1720_s17 = smov 64   ;;  %s76_s13 = int_to_ptr.vmem [resolvable:$true] %s75_s13 }
  0x12   :  { %s1721_s2 = smov 4   ;;  %s1722_s18 = smov [#allocation11]  }
  0x13   :  { %81 = dma.hbm_to_vmem [thread:$0]  %s74_s12, 2048, %s76_s13, [#allocation9], %s1720_s17, %s1720_s17, %s1721_s2  }
  0x14   :  { %s90_s19 = sshll.u32 %s1722_s18, 4  ;;  %s91_s19 = int_to_ptr.vmem [resolvable:$true] %s90_s19 }
  0x15   :  { %96 = dma.hbm_to_vmem [thread:$0]  %s89_s16, 1024, %s91_s19, [#allocation12], %s1720_s17, %s1720_s17, %s1721_s2  }
  0x16   :  { %1701 = dma.done.wait [#allocation3], 128  }
  0x17   :  { %1702 = vsyncadd [#allocation3], 4294967168 }
  0x18   :  { %1703 = dma.done.wait [#allocation6], 1088  }
  0x19   :  { %1704 = vsyncadd [#allocation6], 4294966208 }
  0x1a   :  { %1705 = dma.done.wait [#allocation9], 10240  }
  0x1b   :  { %1706 = vsyncadd [#allocation9], 4294957056 }
  0x1c   :  { %1707 = dma.done.wait [#allocation12], 1024  }
  0x1d   :  { %1708 = vsyncadd [#allocation12], 4294966272  ;;  %v1048_v0 = vld [vmem:[#allocation5 + $0x20] sm:$0xf]  ;;  %v1424_v1 = vld [vmem:[#allocation5 + $0x2c] sm:$0xf0] }
  0x1e   :  { %v1422_v2 = vld [vmem:[#allocation5 + $0x24] sm:$0xf]  ;;  %v1049_v3 = vor.u32 %v1424_v1, %v1048_v0  ;;  %v1050_v4 = vld [vmem:[#allocation5 + $0x30] sm:$0xf0]  ;;  %v1056_v5 = vld [vmem:[#allocation5 + $0x28] sm:$0xf] }
  0x1f   :  { %v1425_v6 = vld [vmem:[#allocation5 + $0x34] sm:$0xf0]  ;;  %v1053_v7 = vor.u32 %v1422_v2, %v1050_v4  ;;  %v1032_v9 = vld [vmem:[#allocation5] sm:$0xf]  ;;  %v1420_v10 = vld [vmem:[#allocation5 + $0xc] sm:$0xf0] }
  0x20   :  { %v1057_v8 = vor.u32 %v1425_v6, %v1056_v5  ;;  %v1418_v11 = vld [vmem:[#allocation5 + $0x4] sm:$0xf]  ;;  %194 = vmatpush.bf16.msra.mxu3 %v1049_v3  ;;  %v1033_v12 = vor.u32 %v1420_v10, %v1032_v9  ;;  %v1034_v13 = vld [vmem:[#allocation5 + $0x10] sm:$0xf0]  ;;  %v1040_v14 = vld [vmem:[#allocation5 + $0x8] sm:$0xf] }
  0x21   :  { %v1421_v15 = vld [vmem:[#allocation5 + $0x14] sm:$0xf0]  ;;  %207 = vmatpush.bf16.msra.mxu1 %v1053_v7  ;;  %v1037_v16 = vor.u32 %v1418_v11, %v1034_v13  ;;  %vm184_vm0 = vcmask 261120   ;;  %v1423_v19 = vld [vmem:[#allocation5 + $0x2c] sm:$0xf]  ;;  %s1017_s24 = sshll.u32 %s1823_s9, 4  ;;  %s1018_s24 = int_to_ptr.hbm [resolvable:$true] %s1017_s24 }
  0x22   :  { %220 = vmatpush.bf16.msra.mxu2 %v1057_v8  ;;  %v1041_v17 = vor.u32 %v1421_v15, %v1040_v14  ;;  %v124_v18 = vld [vmem:[#allocation2] sm:$0xff]  ;;  %v1419_v22 = vld [vmem:[#allocation5 + $0xc] sm:$0xf]  ;;  %v1188_v24 = vld [vmem:[#allocation8 + $0xf0] sm:$0xf] }
  0x23   :  { %v1058_v20 = vld [vmem:[#allocation5 + $0x38] sm:$0xf0]  ;;  %v1792_v25 = vpack.c.bf16 %v124_v18, %v124_v18  ;;  %v1180_v27 = vld [vmem:[#allocation8 + $0xe0] sm:$0xf]  ;;  %v1455_v28 = vld [vmem:[#allocation8 + $0xe4] sm:$0xf0] }
  0x24   :  { %v1061_v21 = vor.u32 %v1423_v19, %v1058_v20  ;;  %v1042_v23 = vld [vmem:[#allocation5 + $0x18] sm:$0xf0]  ;;  %195 = vmatpush.bf16.msra.mxu3 %v1033_v12  ;;  %v1124_v30 = vld [vmem:[#allocation8 + $0x70] sm:$0xf]  ;;  %v1181_v36 = vor.u32 %v1455_v28, %v1180_v27  ;;  %v1116_v38 = vld [vmem:[#allocation8 + $0x60] sm:$0xf] }
  0x25   :  { %v1457_v26 = vld [vmem:[#allocation8 + $0xf4] sm:$0xf0]  ;;  %v1252_v32 = vld [vmem:[#allocation8 + $0x170] sm:$0xf]  ;;  %208 = vmatpush.bf16.msra.mxu1 %v1037_v16  ;;  %v1045_v35 = vor.u32 %v1419_v22, %v1042_v23  ;;  %v1439_v39 = vld [vmem:[#allocation8 + $0x64] sm:$0xf0] }
  0x26   :  { %v1189_v29 = vor.u32 %v1457_v26, %v1188_v24  ;;  %v1441_v31 = vld [vmem:[#allocation8 + $0x74] sm:$0xf0]  ;;  %221 = vmatpush.bf16.msra.mxu2 %v1041_v17  ;;  %v1244_v40 = vld [vmem:[#allocation8 + $0x160] sm:$0xf]  ;;  %v1172_v41 = vld [vmem:[#allocation8 + $0xd0] sm:$0xf]  ;;  %v1117_v43 = vor.u32 %v1439_v39, %v1116_v38 }
  0x27   :  { %v1125_v33 = vor.u32 %v1441_v31, %v1124_v30  ;;  %v1473_v34 = vld [vmem:[#allocation8 + $0x174] sm:$0xf0]  ;;  %1062 = vmatmul.msk.bf16.vlgmr.msra.gmra.mxu3 %vm184_vm0, %v1792_v25  ;;  %v1471_v44 = vld [vmem:[#allocation8 + $0x164] sm:$0xf0]  ;;  %v1108_v45 = vld [vmem:[#allocation8 + $0x50] sm:$0xf] }
  0x28   :  { %233 = vmatpush.bf16.msrb.mxu3 %v1061_v21  ;;  %v1253_v37 = vor.u32 %v1473_v34, %v1252_v32  ;;  %v1453_v42 = vld [vmem:[#allocation8 + $0xd4] sm:$0xf0]  ;;  %1063 = vmatmul.msk.bf16.vlgmr.msra.gmra.mxu1 %vm184_vm0, %v1792_v25  ;;  %v1245_v47 = vor.u32 %v1471_v44, %v1244_v40  ;;  %v1236_v49 = vld [vmem:[#allocation8 + $0x150] sm:$0xf]  ;;  %v1164_v51 = vld [vmem:[#allocation8 + $0xc0] sm:$0xf] }
  0x29   :  { %651 = vmatpush.bf16.msrb.mxu1 %v1189_v29  ;;  %638 = vmatpush.bf16.msra.mxu0 %v1125_v33  ;;  %v1437_v46 = vld [vmem:[#allocation8 + $0x54] sm:$0xf0]  ;;  %v1173_v48 = vor.u32 %v1453_v42, %v1172_v41  ;;  %v1451_v52 = vld [vmem:[#allocation8 + $0xc4] sm:$0xf0]  ;;  %v1100_v54 = vld [vmem:[#allocation8 + $0x40] sm:$0xf] }
  0x2a   :  { %1064 = vmatmul.msk.bf16.vlgmr.msra.gmra.mxu2 %vm184_vm0, %v1792_v25  ;;  %v1469_v50 = vld [vmem:[#allocation8 + $0x154] sm:$0xf0]  ;;  %v1109_v53 = vor.u32 %v1437_v46, %v1108_v45  ;;  %v1435_v55 = vld [vmem:[#allocation8 + $0x44] sm:$0xf0]  ;;  %v1316_v57 = vld [vmem:[#allocation8 + $0x1f0] sm:$0xf]  ;;  %v1165_v59 = vor.u32 %v1451_v52, %v1164_v51 }
  0x2b   :  { %664 = vmatpush.bf16.msrb.mxu2 %v1253_v37  ;;  %v1237_v56 = vor.u32 %v1469_v50, %v1236_v49  ;;  %v1489_v58 = vld [vmem:[#allocation8 + $0x1f4] sm:$0xf0]  ;;  %v1228_v60 = vld [vmem:[#allocation8 + $0x140] sm:$0xf]  ;;  %v1467_v61 = vld [vmem:[#allocation8 + $0x144] sm:$0xf0]  ;;  %v1101_v1 = vor.u32 %v1435_v55, %v1100_v54 }
  0x2c   :  { %234 = vmatpush.bf16.msrb.mxu3 %v1045_v35  ;;  %v1317_v62 = vor.u32 %v1489_v58, %v1316_v57  ;;  %v1156_v63 = vld [vmem:[#allocation8 + $0xb0] sm:$0xf]  ;;  %v1449_v0 = vld [vmem:[#allocation8 + $0xb4] sm:$0xf0]  ;;  %v1308_v4 = vld [vmem:[#allocation8 + $0x1e0] sm:$0xf]  ;;  %v1229_v6 = vor.u32 %v1467_v61, %v1228_v60 }
  0x2d   :  { %652 = vmatpush.bf16.msrb.mxu1 %v1181_v36  ;;  %639 = vmatpush.bf16.msra.mxu0 %v1117_v43  ;;  %v1092_v2 = vld [vmem:[#allocation8 + $0x30] sm:$0xf]  ;;  %v1433_v3 = vld [vmem:[#allocation8 + $0x34] sm:$0xf0]  ;;  %v1487_v5 = vld [vmem:[#allocation8 + $0x1e4] sm:$0xf0]  ;;  %v1157_v8 = vor.u32 %v1449_v0, %v1156_v63 }
  0x2e   :  { %v1309_v7 = vor.u32 %v1487_v5, %v1308_v4  ;;  %v1148_v9 = vld [vmem:[#allocation8 + $0xa0] sm:$0xf]  ;;  %v1220_v10 = vld [vmem:[#allocation8 + $0x130] sm:$0xf]  ;;  %v1465_v11 = vld [vmem:[#allocation8 + $0x134] sm:$0xf0]  ;;  %v1093_v13 = vor.u32 %v1433_v3, %v1092_v2 }
  0x2f   :  { %665 = vmatpush.bf16.msrb.mxu2 %v1245_v47  ;;  %v1447_v12 = vld [vmem:[#allocation8 + $0xa4] sm:$0xf0]  ;;  %v1300_v14 = vld [vmem:[#allocation8 + $0x1d0] sm:$0xf]  ;;  %v1485_v15 = vld [vmem:[#allocation8 + $0x1d4] sm:$0xf0]  ;;  %v1221_v19 = vor.u32 %v1465_v11, %v1220_v10 }
  0x30   :  { %677 = vmatpush.bf16.msra.mxu3 %v1317_v62  ;;  %v1084_v16 = vld [vmem:[#allocation8 + $0x20] sm:$0xf]  ;;  %v1431_v17 = vld [vmem:[#allocation8 + $0x24] sm:$0xf0]  ;;  %v1301_v18 = vor.u32 %v1485_v15, %v1300_v14  ;;  %v1149_v21 = vor.u32 %v1447_v12, %v1148_v9  ;;  %v1140_v26 = vld [vmem:[#allocation8 + $0x90] sm:$0xf] }
  0x31   :  { %653 = vmatpush.bf16.msrb.mxu1 %v1173_v48  ;;  %640 = vmatpush.bf16.msra.mxu0 %v1109_v53  ;;  %v1212_v20 = vld [vmem:[#allocation8 + $0x120] sm:$0xf]  ;;  %v1463_v22 = vld [vmem:[#allocation8 + $0x124] sm:$0xf0]  ;;  %v1445_v27 = vld [vmem:[#allocation8 + $0x94] sm:$0xf0]  ;;  %v1085_v28 = vor.u32 %v1431_v17, %v1084_v16 }
  0x32   :  { %v1292_v23 = vld [vmem:[#allocation8 + $0x1c0] sm:$0xf]  ;;  %v1483_v24 = vld [vmem:[#allocation8 + $0x1c4] sm:$0xf0]  ;;  %v1076_v29 = vld [vmem:[#allocation8 + $0x10] sm:$0xf]  ;;  %v1213_v32 = vor.u32 %v1463_v22, %v1212_v20  ;;  %v1141_v33 = vor.u32 %v1445_v27, %v1140_v26 }
  0x33   :  { %666 = vmatpush.bf16.msrb.mxu2 %v1237_v56  ;;  %v1429_v30 = vld [vmem:[#allocation8 + $0x14] sm:$0xf0]  ;;  %v1293_v31 = vor.u32 %v1483_v24, %v1292_v23  ;;  %v1204_v34 = vld [vmem:[#allocation8 + $0x110] sm:$0xf]  ;;  %v1132_v36 = vld [vmem:[#allocation8 + $0x80] sm:$0xf] }
  0x34   :  { %678 = vmatpush.bf16.msra.mxu3 %v1309_v7  ;;  %v1461_v35 = vld [vmem:[#allocation8 + $0x114] sm:$0xf0]  ;;  %v1443_v37 = vld [vmem:[#allocation8 + $0x84] sm:$0xf0]  ;;  %v1456_v38 = vld [vmem:[#allocation8 + $0xf4] sm:$0xf]  ;;  %v1077_v39 = vor.u32 %v1429_v30, %v1076_v29 }
  0x35   :  { %654 = vmatpush.bf16.msrb.mxu1 %v1165_v59  ;;  %641 = vmatpush.bf16.msra.mxu0 %v1101_v1  ;;  %v1068_v40 = vld [vmem:[#allocation8] sm:$0xf]  ;;  %v1427_v41 = vld [vmem:[#allocation8 + $0x4] sm:$0xf0]  ;;  %v1205_v42 = vor.u32 %v1461_v35, %v1204_v34  ;;  %v1440_v43 = vld [vmem:[#allocation8 + $0x74] sm:$0xf]  ;;  %v1133_v45 = vor.u32 %v1443_v37, %v1132_v36 }
  0x36   :  { %v1126_v44 = vld [vmem:[#allocation8 + $0x78] sm:$0xf0]  ;;  %v1196_v46 = vld [vmem:[#allocation8 + $0x100] sm:$0xf]  ;;  %v1459_v47 = vld [vmem:[#allocation8 + $0x104] sm:$0xf0]  ;;  %v1069_v49 = vor.u32 %v1427_v41, %v1068_v40 }
  0x37   :  { %667 = vmatpush.bf16.msrb.mxu2 %v1229_v6  ;;  %1065 = vmatmul.msk.bf16.vlgmr.msrb.gmra.mxu3 %vm184_vm0, %v1792_v25  ;;  %v1190_v25 = vld [vmem:[#allocation8 + $0xf8] sm:$0xf0]  ;;  %v1472_v50 = vld [vmem:[#allocation8 + $0x174] sm:$0xf]  ;;  %v1454_v52 = vld [vmem:[#allocation8 + $0xe4] sm:$0xf]  ;;  %v1129_v54 = vor.u32 %v1440_v43, %v1126_v44  ;;  %v1197_v55 = vor.u32 %v1459_v47, %v1196_v46 }
  0x38   :  { %679 = vmatpush.bf16.msra.mxu3 %v1301_v18  ;;  %v1193_v48 = vor.u32 %v1456_v38, %v1190_v25  ;;  %v1254_v51 = vld [vmem:[#allocation8 + $0x178] sm:$0xf0]  ;;  %v1182_v53 = vld [vmem:[#allocation8 + $0xe8] sm:$0xf0]  ;;  %v1452_v58 = vld [vmem:[#allocation8 + $0xd4] sm:$0xf] }
  0x39   :  { %655 = vmatpush.bf16.msrb.mxu1 %v1157_v8  ;;  %642 = vmatpush.bf16.msra.mxu0 %v1093_v13  ;;  %v1257_v56 = vor.u32 %v1472_v50, %v1254_v51  ;;  %v1185_v57 = vor.u32 %v1454_v52, %v1182_v53  ;;  %v1174_v59 = vld [vmem:[#allocation8 + $0xd8] sm:$0xf0]  ;;  %v1284_v61 = vld [vmem:[#allocation8 + $0x1b0] sm:$0xf]  ;;  %v1481_v62 = vld [vmem:[#allocation8 + $0x1b4] sm:$0xf0] }
  0x3a   :  { %v1177_v60 = vor.u32 %v1452_v58, %v1174_v59  ;;  %v1285_v63 = vor.u32 %v1481_v62, %v1284_v61  ;;  %v1438_v0 = vld [vmem:[#allocation8 + $0x64] sm:$0xf]  ;;  %v1118_v1 = vld [vmem:[#allocation8 + $0x68] sm:$0xf0]  ;;  %v1276_v9 = vld [vmem:[#allocation8 + $0x1a0] sm:$0xf] }
  0x3b   :  { %668 = vmatpush.bf16.msrb.mxu2 %v1221_v19  ;;  %v1470_v2 = vld [vmem:[#allocation8 + $0x164] sm:$0xf]  ;;  %v1121_v3 = vor.u32 %v1438_v0, %v1118_v1  ;;  %v1246_v4 = vld [vmem:[#allocation8 + $0x168] sm:$0xf0]  ;;  %v1479_v10 = vld [vmem:[#allocation8 + $0x1a4] sm:$0xf0] }
  0x3c   :  { %680 = vmatpush.bf16.msra.mxu3 %v1293_v31  ;;  %v1249_v5 = vor.u32 %v1470_v2, %v1246_v4  ;;  %v1450_v6 = vld [vmem:[#allocation8 + $0xc4] sm:$0xf]  ;;  %v1166_v7 = vld [vmem:[#allocation8 + $0xc8] sm:$0xf0]  ;;  %v1277_v11 = vor.u32 %v1479_v10, %v1276_v9  ;;  %v1436_v12 = vld [vmem:[#allocation8 + $0x54] sm:$0xf] }
  0x3d   :  { %656 = vmatpush.bf16.msrb.mxu1 %v1149_v21  ;;  %643 = vmatpush.bf16.msra.mxu0 %v1085_v28  ;;  %v1169_v8 = vor.u32 %v1450_v6, %v1166_v7  ;;  %v1110_v13 = vld [vmem:[#allocation8 + $0x58] sm:$0xf0]  ;;  %v1468_v14 = vld [vmem:[#allocation8 + $0x154] sm:$0xf]  ;;  %v1268_v21 = vld [vmem:[#allocation8 + $0x190] sm:$0xf] }
  0x3e   :  { %v1113_v15 = vor.u32 %v1436_v12, %v1110_v13  ;;  %v1238_v16 = vld [vmem:[#allocation8 + $0x158] sm:$0xf0]  ;;  %v1448_v18 = vld [vmem:[#allocation8 + $0xb4] sm:$0xf]  ;;  %v1477_v22 = vld [vmem:[#allocation8 + $0x194] sm:$0xf0] }
  0x3f   :  { %669 = vmatpush.bf16.msrb.mxu2 %v1213_v32  ;;  %v1241_v17 = vor.u32 %v1468_v14, %v1238_v16  ;;  %v1158_v19 = vld [vmem:[#allocation8 + $0xb8] sm:$0xf0]  ;;  %v1269_v23 = vor.u32 %v1477_v22, %v1268_v21  ;;  %v1434_v24 = vld [vmem:[#allocation8 + $0x44] sm:$0xf]  ;;  %v1102_v26 = vld [vmem:[#allocation8 + $0x48] sm:$0xf0] }
  0x40   :  { %681 = vmatpush.bf16.msra.mxu3 %v1285_v63  ;;  %v1161_v20 = vor.u32 %v1448_v18, %v1158_v19  ;;  %v1466_v27 = vld [vmem:[#allocation8 + $0x144] sm:$0xf]  ;;  %v1105_v28 = vor.u32 %v1434_v24, %v1102_v26  ;;  %v1230_v29 = vld [vmem:[#allocation8 + $0x148] sm:$0xf0]  ;;  %v1260_v34 = vld [vmem:[#allocation8 + $0x180] sm:$0xf] }
  0x41   :  { %657 = vmatpush.bf16.msrb.mxu1 %v1141_v33  ;;  %644 = vmatpush.bf16.msra.mxu0 %v1077_v39  ;;  %v1233_v30 = vor.u32 %v1466_v27, %v1230_v29  ;;  %v1446_v31 = vld [vmem:[#allocation8 + $0xa4] sm:$0xf]  ;;  %v1150_v32 = vld [vmem:[#allocation8 + $0xa8] sm:$0xf0]  ;;  %v1475_v35 = vld [vmem:[#allocation8 + $0x184] sm:$0xf0] }
  0x42   :  { %v1153_v33 = vor.u32 %v1446_v31, %v1150_v32  ;;  %v1261_v36 = vor.u32 %v1475_v35, %v1260_v34  ;;  %v1432_v37 = vld [vmem:[#allocation8 + $0x34] sm:$0xf]  ;;  %v1094_v38 = vld [vmem:[#allocation8 + $0x38] sm:$0xf0]  ;;  %v1430_v47 = vld [vmem:[#allocation8 + $0x24] sm:$0xf] }
  0x43   :  { %670 = vmatpush.bf16.msrb.mxu2 %v1205_v42  ;;  %v1464_v39 = vld [vmem:[#allocation8 + $0x134] sm:$0xf]  ;;  %v1097_v25 = vor.u32 %v1432_v37, %v1094_v38  ;;  %v1222_v40 = vld [vmem:[#allocation8 + $0x138] sm:$0xf0]  ;;  %v1462_v50 = vld [vmem:[#allocation8 + $0x124] sm:$0xf] }
  0x44   :  { %682 = vmatpush.bf16.msra.mxu3 %v1277_v11  ;;  %v1488_v41 = vld [vmem:[#allocation8 + $0x1f4] sm:$0xf]  ;;  %v1318_v42 = vld [vmem:[#allocation8 + $0x1f8] sm:$0xf0]  ;;  %v1225_v43 = vor.u32 %v1464_v39, %v1222_v40  ;;  %v1214_v51 = vld [vmem:[#allocation8 + $0x128] sm:$0xf0] }
  0x45   :  { %658 = vmatpush.bf16.msrb.mxu1 %v1133_v45  ;;  %645 = vmatpush.bf16.msra.mxu0 %v1069_v49  ;;  %v1321_v44 = vor.u32 %v1488_v41, %v1318_v42  ;;  %v1444_v45 = vld [vmem:[#allocation8 + $0x94] sm:$0xf]  ;;  %v1142_v46 = vld [vmem:[#allocation8 + $0x98] sm:$0xf0]  ;;  %v1086_v49 = vld [vmem:[#allocation8 + $0x28] sm:$0xf0]  ;;  %v1217_v53 = vor.u32 %v1462_v50, %v1214_v51 }
  0x46   :  { %v1089_v52 = vor.u32 %v1430_v47, %v1086_v49  ;;  %v1134_v58 = vld [vmem:[#allocation8 + $0x88] sm:$0xf0]  ;;  %v1078_v61 = vld [vmem:[#allocation8 + $0x18] sm:$0xf0]  ;;  %v1460_v62 = vld [vmem:[#allocation8 + $0x114] sm:$0xf] }
  0x47   :  { %671 = vmatpush.bf16.msrb.mxu2 %v1197_v55  ;;  %v1310_v55 = vld [vmem:[#allocation8 + $0x1e8] sm:$0xf0]  ;;  %v1206_v0 = vld [vmem:[#allocation8 + $0x118] sm:$0xf0]  ;;  %v1484_v1 = vld [vmem:[#allocation8 + $0x1d4] sm:$0xf] }
  0x48   :  { %683 = vmatpush.bf16.msra.mxu3 %v1269_v23  ;;  %v1302_v2 = vld [vmem:[#allocation8 + $0x1d8] sm:$0xf0]  ;;  %v1070_v6 = vld [vmem:[#allocation8 + $0x8] sm:$0xf0]  ;;  %v1458_v7 = vld [vmem:[#allocation8 + $0x104] sm:$0xf] }
  0x49   :  { %703 = vmatpush.bf16.msra.mxu1 %v1193_v48  ;;  %690 = vmatpush.bf16.msrb.mxu0 %v1129_v54  ;;  %v1145_v48 = vor.u32 %v1444_v45, %v1142_v46  ;;  %v1486_v54 = vld [vmem:[#allocation8 + $0x1e4] sm:$0xf]  ;;  %v1305_v4 = vor.u32 %v1484_v1, %v1302_v2  ;;  %v1198_v9 = vld [vmem:[#allocation8 + $0x108] sm:$0xf0]  ;;  %v134_v14 = vld [vmem:[#allocation7] sm:$0xf] }
  0x4a   :  { %v1482_v10 = vld [vmem:[#allocation8 + $0x1c4] sm:$0xf]  ;;  %v1294_v11 = vld [vmem:[#allocation8 + $0x1c8] sm:$0xf0]  ;;  %v1201_v12 = vor.u32 %v1458_v7, %v1198_v9  ;;  %v1286_v16 = vld [vmem:[#allocation8 + $0x1b8] sm:$0xf0] }
  0x4b   :  { %716 = vmatpush.bf16.msra.mxu2 %v1257_v56  ;;  %v1442_v56 = vld [vmem:[#allocation8 + $0x84] sm:$0xf]  ;;  %v1297_v13 = vor.u32 %v1482_v10, %v1294_v11  ;;  %v137_v18 = vperm.slane %v134_v14, 1  ;;  %v1476_v23 = vld [vmem:[#allocation8 + $0x194] sm:$0xf]  ;;  %v136_v27 = vperm.slane %v134_v14, 0 }
  0x4c   :  { %684 = vmatpush.bf16.msra.mxu3 %v1261_v36  ;;  %v1137_v59 = vor.u32 %v1442_v56, %v1134_v58  ;;  %v1478_v19 = vld [vmem:[#allocation8 + $0x1a4] sm:$0xf]  ;;  %v1270_v24 = vld [vmem:[#allocation8 + $0x198] sm:$0xf0]  ;;  %v138_v29 = vperm.slane %v134_v14, 2  ;;  %v139_v45 = vperm.slane %v134_v14, 3 }
  0x4d   :  { %704 = vmatpush.bf16.msra.mxu1 %v1185_v57  ;;  %691 = vmatpush.bf16.msrb.mxu0 %v1121_v3  ;;  %v1313_v57 = vor.u32 %v1486_v54, %v1310_v55  ;;  %v1209_v3 = vor.u32 %v1460_v62, %v1206_v0  ;;  %v1474_v31 = vld [vmem:[#allocation8 + $0x184] sm:$0xf]  ;;  %v1262_v32 = vld [vmem:[#allocation8 + $0x188] sm:$0xf0]  ;;  %v1497_v51 = vld [vmem:[#allocation10 + $0x38] sm:$0xff] }
  0x4e   :  { %v1265_v38 = vor.u32 %v1474_v31, %v1262_v32  ;;  %v1494_v54 = vld [vmem:[#allocation10 + $0x20] sm:$0xff]  ;;  %v1493_v55 = vld [vmem:[#allocation10 + $0x18] sm:$0xff]  ;;  %v1504_v58 = vld [vmem:[#allocation10 + $0x70] sm:$0xff] }
  0x4f   :  { %717 = vmatpush.bf16.msra.mxu2 %v1249_v5  ;;  %v1426_v5 = vld [vmem:[#allocation8 + $0x4] sm:$0xf]  ;;  %v1505_v56 = vld [vmem:[#allocation10 + $0x78] sm:$0xff]  ;;  %v1500_v1 = vld [vmem:[#allocation10 + $0x50] sm:$0xff] }
  0x50   :  { %729 = vmatpush.bf16.msrb.mxu3 %v1321_v44  ;;  %v1502_v62 = vld [vmem:[#allocation10 + $0x60] sm:$0xff]  ;;  %v1501_v0 = vld [vmem:[#allocation10 + $0x58] sm:$0xff] }
  0x51   :  { %705 = vmatpush.bf16.msra.mxu1 %v1177_v60  ;;  %692 = vmatpush.bf16.msrb.mxu0 %v1113_v15  ;;  %v1428_v60 = vld [vmem:[#allocation8 + $0x14] sm:$0xf]  ;;  %v1513_v11 = vld [vmem:[#allocation11 + $0x38] sm:$0xff] }
  0x52   :  { %v1081_v63 = vor.u32 %v1428_v60, %v1078_v61  ;;  %v1480_v15 = vld [vmem:[#allocation8 + $0x1b4] sm:$0xf]  ;;  %v1503_v60 = vld [vmem:[#allocation10 + $0x68] sm:$0xff]  ;;  %v1490_v61 = vld [vmem:[#allocation10] sm:$0xff] }
  0x53   :  { %718 = vmatpush.bf16.msra.mxu2 %v1241_v17  ;;  %v1289_v17 = vor.u32 %v1480_v15, %v1286_v16  ;;  %v1512_v15 = vld [vmem:[#allocation11 + $0x30] sm:$0xff] }
  0x54   :  { %730 = vmatpush.bf16.msrb.mxu3 %v1313_v57  ;;  %v1492_v57 = vld [vmem:[#allocation10 + $0x10] sm:$0xff] }
  0x55   :  { %706 = vmatpush.bf16.msra.mxu1 %v1169_v8  ;;  %693 = vmatpush.bf16.msrb.mxu0 %v1105_v28  ;;  %v1073_v8 = vor.u32 %v1426_v5, %v1070_v6  ;;  %v312_v6 = vld [vmem:[%s1818_s4] sm:$0x3] }
  0x56   :  { %v314_v9 = vperm.slane %v312_v6, 0 }
  0x57   :  { %719 = vmatpush.bf16.msra.mxu2 %v1233_v30  ;;  %v1273_v30 = vor.u32 %v1476_v23, %v1270_v24  ;;  %v315_v24 = vperm.slane %v312_v6, 1 }
  0x58   :  { %731 = vmatpush.bf16.msrb.mxu3 %v1305_v4  ;;  %v1499_v4 = vld [vmem:[#allocation10 + $0x48] sm:$0xff] }
  0x59   :  { %707 = vmatpush.bf16.msra.mxu1 %v1161_v20  ;;  %694 = vmatpush.bf16.msrb.mxu0 %v1097_v25  ;;  %v1278_v20 = vld [vmem:[#allocation8 + $0x1a8] sm:$0xf0] }
  0x5a   :  { %v1281_v21 = vor.u32 %v1478_v19, %v1278_v20 }
  0x5b   :  { %720 = vmatpush.bf16.msra.mxu2 %v1225_v43 }
  0x5c   :  { %732 = vmatpush.bf16.msrb.mxu3 %v1297_v13 }
  0x5d   :  { %708 = vmatpush.bf16.msra.mxu1 %v1153_v33  ;;  %695 = vmatpush.bf16.msrb.mxu0 %v1089_v52  ;;  %v1496_v52 = vld [vmem:[#allocation10 + $0x30] sm:$0xff] }
  0x5f   :  { %721 = vmatpush.bf16.msra.mxu2 %v1217_v53  ;;  %v1495_v53 = vld [vmem:[#allocation10 + $0x28] sm:$0xff] }
  0x60   :  { %733 = vmatpush.bf16.msrb.mxu3 %v1289_v17 }
  0x61   :  { %709 = vmatpush.bf16.msra.mxu1 %v1145_v48  ;;  %696 = vmatpush.bf16.msrb.mxu0 %v1081_v63 }
  0x63   :  { %722 = vmatpush.bf16.msra.mxu2 %v1209_v3 }
  0x64   :  { %734 = vmatpush.bf16.msrb.mxu3 %v1281_v21 }
  0x65   :  { %710 = vmatpush.bf16.msra.mxu1 %v1137_v59  ;;  %697 = vmatpush.bf16.msrb.mxu0 %v1073_v8  ;;  %v1491_v59 = vld [vmem:[#allocation10 + $0x8] sm:$0xff]  ;;  %v1498_v8 = vld [vmem:[#allocation10 + $0x40] sm:$0xff] }
  0x67   :  { %723 = vmatpush.bf16.msra.mxu2 %v1201_v12 }
  0x68   :  { %735 = vmatpush.bf16.msrb.mxu3 %v1273_v30 }
  0x6c   :  { %736 = vmatpush.bf16.msrb.mxu3 %v1265_v38  ;;  %v1510_v38 = vld [vmem:[#allocation11 + $0x20] sm:$0xff] }
  0xa5   :  { %v210_v22 = vpop.f32.mrf.mxu1 }
  0xa6   :  { %v211_v26 = vadd.f32 %v210_v22, %v137_v18 }
  0xa8   :  { %v241_v28 = vmax.f32 %v211_v26, 0.0 }
  0xaa   :  { %v245_v33 = vpack.c.bf16 %v241_v28, %v241_v28  ;;  %v197_v34 = vpop.f32.mrf.mxu3 }
  0xab   :  { %v198_v35 = vadd.f32 %v197_v34, %v136_v27 }
  0xac   :  { %659 = vmatmul.bf16.vlgmr.msrb.gmra.mxu1 %v245_v33 }
  0xad   :  { %v223_v36 = vpop.f32.mrf.mxu2  ;;  %v240_v39 = vmax.f32 %v198_v35, 0.0  ;;  %v212_v25 = vpop.f32.mrf.mxu1  ;;  %891 = vmatpush.bf16.msrb.mxu1 %v1505_v56 }
  0xae   :  { %v224_v37 = vadd.f32 %v223_v36, %v138_v29  ;;  %v1508_v25 = vld [vmem:[#allocation11 + $0x10] sm:$0xff] }
  0xaf   :  { %v244_v41 = vpack.c.bf16 %v240_v39, %v240_v39  ;;  %v1509_v39 = vld [vmem:[#allocation11 + $0x18] sm:$0xff] }
  0xb0   :  { %v242_v40 = vmax.f32 %v224_v37, 0.0  ;;  %v1511_v37 = vld [vmem:[#allocation11 + $0x28] sm:$0xff] }
  0xb1   :  { %646 = vmatmul.bf16.vlgmr.msra.gmra.mxu0 %v244_v41  ;;  %892 = vmatpush.bf16.msrb.mxu1 %v1504_v58 }
  0xb2   :  { %v246_v42 = vpack.c.bf16 %v242_v40, %v242_v40  ;;  %v199_v43 = vpop.f32.mrf.mxu3  ;;  %878 = vmatpush.bf16.msra.mxu0 %v1497_v51  ;;  %v1507_v40 = vld [vmem:[#allocation11 + $0x8] sm:$0xff]  ;;  %v1528_v51 = vld [vmem:[%s1822_s8] ss:$0 sm:$0xff] }
  0xb4   :  { %672 = vmatmul.bf16.vlgmr.msrb.gmra.mxu2 %v246_v42 }
  0xb5   :  { %v225_v44 = vpop.f32.mrf.mxu2  ;;  %893 = vmatpush.bf16.msrb.mxu1 %v1503_v60  ;;  %974 = vmatpush.bf16.msrb.mxu2 %v1513_v11 }
  0xb6   :  { %879 = vmatpush.bf16.msra.mxu0 %v1496_v52  ;;  %v1527_v44 = vld [vmem:[%s1820_s6] ss:$0 sm:$0xff]  ;;  %s1723_s6 = smov [#allocation13]  }
  0xb7   :  { %s1015_s8 = sshll.u32 %s1723_s6, 4  ;;  %s1016_s8 = int_to_ptr.vmem [resolvable:$true] %s1015_s8 }
  0xb9   :  { %894 = vmatpush.bf16.msrb.mxu1 %v1502_v62  ;;  %975 = vmatpush.bf16.msrb.mxu2 %v1512_v15 }
  0xba   :  { %v236_v46 = vpop.f32.mrf.mxu3  ;;  %880 = vmatpush.bf16.msra.mxu0 %v1495_v53 }
  0xbb   :  { %v237_v47 = vadd.f32 %v236_v46, %v139_v45 }
  0xbc   :  { %711 = vmatmul.bf16.vlgmr.msra.gmra.mxu1 %v245_v33 }
  0xbd   :  { %v243_v48 = vmax.f32 %v237_v47, 0.0  ;;  %895 = vmatpush.bf16.msrb.mxu1 %v1501_v0  ;;  %976 = vmatpush.bf16.msrb.mxu2 %v1511_v37 }
  0xbe   :  { %881 = vmatpush.bf16.msra.mxu0 %v1494_v54 }
  0xbf   :  { %v247_v49 = vpack.c.bf16 %v243_v48, %v243_v48 }
  0xc1   :  { %685 = vmatmul.bf16.vlgmr.msra.gmra.mxu3 %v247_v49  ;;  %698 = vmatmul.bf16.vlgmr.msrb.gmra.mxu0 %v244_v41  ;;  %v1506_v41 = vld [vmem:[#allocation11] sm:$0xff] }
  0xc2   :  { %v238_v50 = vpop.f32.mrf.mxu3  ;;  %882 = vmatpush.bf16.msra.mxu0 %v1493_v55  ;;  %896 = vmatpush.bf16.msrb.mxu1 %v1500_v1 }
  0xc3   :  { %977 = vmatpush.bf16.msrb.mxu2 %v1510_v38 }
  0xc4   :  { %724 = vmatmul.bf16.vlgmr.msra.gmra.mxu2 %v246_v42 }
  0xc6   :  { %883 = vmatpush.bf16.msra.mxu0 %v1492_v57  ;;  %897 = vmatpush.bf16.msrb.mxu1 %v1499_v4 }
  0xc7   :  { %978 = vmatpush.bf16.msrb.mxu2 %v1509_v39 }
  0xca   :  { %884 = vmatpush.bf16.msra.mxu0 %v1491_v59  ;;  %898 = vmatpush.bf16.msrb.mxu1 %v1498_v8 }
  0xcb   :  { %979 = vmatpush.bf16.msrb.mxu2 %v1508_v25 }
  0xce   :  { %885 = vmatpush.bf16.msra.mxu0 %v1490_v61 }
  0xcf   :  { %980 = vmatpush.bf16.msrb.mxu2 %v1507_v40 }
  0xd1   :  { %737 = vmatmul.bf16.vlgmr.msrb.gmra.mxu3 %v247_v49 }
  0xd3   :  { %981 = vmatpush.bf16.msrb.mxu2 %v1506_v41 }
 0x129   :  { %v660_v63 = vpop.f32.mrf.mxu1 }
 0x12e   :  { %v647_v2 = vpop.f32.mrf.mxu0 }
 0x12f   :  { %v648_v12 = vadd.f32 %v647_v2, %v314_v9 }
 0x131   :  { %v662_v3 = vpop.f32.mrf.mxu1  ;;  %v661_v16 = vadd.f32 %v660_v63, %v648_v12 }
 0x136   :  { %v649_v7 = vpop.f32.mrf.mxu0 }
 0x137   :  { %v673_v5 = vpop.f32.mrf.mxu2 }
 0x138   :  { %v674_v18 = vadd.f32 %v673_v5, %v661_v16 }
 0x139   :  { %v712_v10 = vpop.f32.mrf.mxu1 }
 0x13e   :  { %v699_v14 = vpop.f32.mrf.mxu0 }
 0x13f   :  { %v675_v13 = vpop.f32.mrf.mxu2  ;;  %v700_v28 = vadd.f32 %v699_v14, %v315_v24 }
 0x141   :  { %v714_v17 = vpop.f32.mrf.mxu1  ;;  %v713_v30 = vadd.f32 %v712_v10, %v700_v28 }
 0x144   :  { %v686_v19 = vpop.f32.mrf.mxu3 }
 0x145   :  { %v687_v20 = vadd.f32 %v686_v19, %v674_v18 }
 0x146   :  { %v701_v22 = vpop.f32.mrf.mxu0 }
 0x147   :  { %v725_v21 = vpop.f32.mrf.mxu2  ;;  %v742_v23 = vmax.f32 %v687_v20, 0.0 }
 0x148   :  { %v726_v31 = vadd.f32 %v725_v21, %v713_v30 }
 0x149   :  { %v744_v26 = vpack.c.bf16 %v742_v23, %v742_v23 }
 0x14b   :  { %886 = vmatmul.bf16.vlgmr.msra.gmra.mxu0 %v744_v26 }
 0x14c   :  { %v688_v27 = vpop.f32.mrf.mxu3 }
 0x14f   :  { %v727_v29 = vpop.f32.mrf.mxu2 }
 0x154   :  { %v738_v32 = vpop.f32.mrf.mxu3 }
 0x155   :  { %v739_v33 = vadd.f32 %v738_v32, %v726_v31 }
 0x157   :  { %v743_v34 = vmax.f32 %v739_v33, 0.0 }
 0x159   :  { %v745_v35 = vpack.c.bf16 %v743_v34, %v743_v34 }
 0x15b   :  { %899 = vmatmul.bf16.vlgmr.msrb.gmra.mxu1 %v745_v35 }
 0x15c   :  { %v740_v36 = vpop.f32.mrf.mxu3 }
 0x1c8   :  { %v887_v42 = vpop.f32.mrf.mxu0 }
 0x1c9   :  { %v888_v45 = vadd.f32 %v1527_v44, %v887_v42 }
 0x1d0   :  { %v889_v43 = vpop.f32.mrf.mxu0 }
 0x1d8   :  { %v900_v46 = vpop.f32.mrf.mxu1 }
 0x1d9   :  { %v901_v47 = vadd.f32 %v900_v46, %v888_v45 }
 0x1db   :  { %v904_v48 = vmax.f32 %v901_v47, 0.0 }
 0x1dd   :  { %v905_v49 = vpack.c.bf16 %v904_v48, %v904_v48 }
 0x1df   :  { %982 = vmatmul.bf16.vlgmr.msrb.gmra.mxu2 %v905_v49 }
 0x1e0   :  { %v902_v50 = vpop.f32.mrf.mxu1 }
 0x262   :  { %v983_v52 = vpop.f32.mrf.mxu2 }
 0x263   :  { %v984_v53 = vadd.f32 %v1528_v51, %v983_v52 }
 0x265   :  { %987 = vmax.xlane.f32.xlu0 %v984_v53 }
 0x26a   :  { %v985_v54 = vpop.f32.mrf.mxu2 }
 0x2d8   :  { %v988_v55 = vpop.xlane.xlu0 %987 }
 0x2d9   :  { %v989_v56 = vsub.f32 %v984_v53, %v988_v55 }
 0x2db   :  { %v990_v57 = vmul.f32 1.442695, %v989_v56 }
 0x2dd   :  { %1529 = vpow2.f32 %v990_v57 }
 0x2e3   :  { %v1530_v58 = vpop.eup %1529 }
 0x2e4   :  { %992 = vadd.xlane.f32.xlu0 %v1530_v58 }
 0x357   :  { %v993_v59 = vpop.xlane.xlu0 %992 }
 0x358   :  { %1531 = vrcp.f32 %v993_v59  ;;  %v1005_v63 = vand.u32 2147483648, %v993_v59  ;;  %v1003_v1 = vand.u32 2147483647, %v993_v59  ;;  %vm999_vm2 = vweird.f32 %v993_v59 }
 0x35a   :  { %v1006_v3 = vor.u32 1.1754944e-38, %v1005_v63  ;;  %vm1004_vm4 = vcmp.eq.f32.partialorder %v1003_v1, 8.507059e+37 }
 0x35e   :  { %v1532_v60 = vpop.eup %1531 }
 0x35f   :  { %v995_v61 = vmul.f32 %v1532_v60, %v993_v59  ;;  %vm1000_vm1 = vweird.f32 %v1532_v60 }
 0x360   :  { %vm1001_vm3 = vmor %vm999_vm2, %vm1000_vm1 }
 0x361   :  { %v996_v62 = vsub.f32 1.0, %v995_v61 }
 0x363   :  { %v997_v0 = vmul.f32 %v1532_v60, %v996_v62 }
 0x365   :  { %v998_v2 = vadd.f32 %v1532_v60, %v997_v0 }
 0x367   :  { %v1002_v4 = vsel %vm1001_vm3, %v1532_v60, %v998_v2 }
 0x368   :  { %v1007_v5 = vsel %vm1004_vm4, %v1006_v3, %v1002_v4 }
 0x369   :  { %v1008_v6 = vmul.f32 %v1530_v58, %v1007_v5 }
 0x36b   :  { %1009 = vst [vmem:[#allocation13] sm:$0xff] %v1008_v6 }
 0x36c   :  { %1020 = dma.vmem_to_hbm [thread:$0]  %s1016_s8, 128, %s1018_s24, [#allocation4]  }
 0x36d   :  { %1709 = dma.done.wait [#allocation4], 128  }
 0x36e   :  { %1710 = vsyncadd [#allocation4], 4294967168 }
 0x36f   :  { %1025 = vsyncpa [#allocation3], 1 }
 0x370   :  { %1026 = vsyncpa [#allocation6], 1 }
 0x371   :  { %1027 = vsyncpa [#allocation9], 1 }
 0x372   :  { %1028 = vsyncpa [#allocation12], 1 }
 0x373   :  { %1029 = vsyncpa [#allocation4], 1 }

</bundles_post_ra>
